<compile_context>
chip_gen: v7x
topology: tpu7x:2x2x1
jax: 0.10.0
libtpu: 0.0.40
codegen_flags: <defaults>
</compile_context>

<pallas_src>
import functools

import jax
import jax.numpy as jnp
from jax import lax
from jax.experimental import pallas as pl
from jax.experimental.pallas import tpu as pltpu


def _round_up(x, m):
    return ((x + m - 1) // m) * m


def _cdiv(a, b):
    return -(-a // b)


def _vmem_budget_bytes():
    # Generation-aware VMEM budget: ~75% of physical capacity (v5e/v6e: 128 MiB -> 96 MiB,
    # v7x: 64 MiB -> 48 MiB).  Conservative 64 MiB fallback if the query is unavailable.
    cap = 64 * 1024 * 1024
    try:
        info = pltpu.get_tpu_info()
        cap = int(getattr(info, "vmem_capacity_bytes", cap) or cap)
    except Exception:
        pass
    return (3 * cap) // 4


def _vmem_step_estimate(tl, th, c_in, c_out, K, out_bytes):
    # Rough per-grid-step VMEM footprint: double-buffered body + halos + output,
    # resident weights/bias, and in-kernel intermediates (bf16 casts, slab, f32 acc).
    in_buf = 2 * c_in * tl * 4
    halo_buf = (2 * 2 * c_in * th * 4) if K > 1 else 0
    out_buf = 2 * c_out * tl * out_bytes
    w_buf = 2 * (c_out * K * c_in * 2 + c_out * 4)
    scratch = (K + 2) * c_in * tl * 2 + c_out * tl * 4
    return in_buf + halo_buf + out_buf + w_buf + scratch


def _pick_tile_length(L_out, TH, c_in, c_out, K, batch, out_bytes):
    # Largest TL (multiple of TH, power-of-two scaling from TH) that fits the VMEM budget,
    # capped at 8192 (vreg pressure from the unrolled per-tap splices) and at the rounded-up
    # output length; then shrunk if it would starve a 2-TensorCore v7x chip.
    budget = _vmem_budget_bytes()
    tl_cap = max(TH, min(8192, _round_up(L_out, TH)))
    tl = TH
    while tl * 2 <= tl_cap and _vmem_step_estimate(tl * 2, TH, c_in, c_out, K, out_bytes) <= budget:
        tl *= 2
    min_tl = max(TH, min(512, _round_up(L_out, 128)))
    while tl > min_tl and batch * _cdiv(L_out, tl) < 8:
        nxt = tl // 2
        if nxt < min_tl or nxt % TH != 0:
            break
        tl = nxt
    return tl


# ------------------------------------------------------------------
# Pallas kernels
# ------------------------------------------------------------------
def _samepad_conv_kernel(xl_ref, xb_ref, xr_ref, w_ref, b_ref, o_ref, *,
                         K, dilation, pad, TH, L):
    # xl_ref: (C_in, TH)  left-halo block (native dtype)  -> zeroed on the first tile
    # xb_ref: (C_in, TL)  body block                       -> columns >= L zero-masked
    # xr_ref: (C_in, TH)  right-halo block                 -> columns >= L zero-masked
    # w_ref : (C_out, K*C_in) bf16, taps flattened tap-major / channel-minor
    # b_ref : (C_out, 1)  f32 effective bias
    # o_ref : (C_out, TL) output tile (lane-dense stores)
    t = pl.program_id(1)
    TL = o_ref.shape[-1]
    base = t * TL

    # In-kernel "same" pad + bf16 cast (no padded copy of x in HBM).
    col_b = base + lax.broadcasted_iota(jnp.int32, (1, TL), 1)
    xb = jnp.where(col_b < L, xb_ref[...], 0.0).astype(jnp.bfloat16)
    col_r = base + TL + lax.broadcasted_iota(jnp.int32, (1, TH), 1)
    xr = jnp.where(col_r < L, xr_ref[...], 0.0).astype(jnp.bfloat16)
    xl = jnp.where(t > 0, xl_ref[...], 0.0).astype(jnp.bfloat16)   # left "same" pad on tile 0

    # One slab chunk per tap, spliced directly out of the virtual frame [xl | xb | xr]
    # (no full (C_in, TL+2*TH) intermediate); all offsets are static.
    chunks = []
    for k in range(K):
        off = TH - pad + k * dilation
        if off < TH:
            chunks.append(jnp.concatenate([xl[:, off:], xb[:, :off + TL - TH]], axis=1))
        elif off == TH:
            chunks.append(xb)
        else:
            s = off - TH
            chunks.append(jnp.concatenate([xb[:, s:], xr[:, :s]], axis=1))
    slab = jnp.concatenate(chunks, axis=0) if K > 1 else chunks[0]      # (K*C_in, TL)

    acc = jnp.dot(w_ref[...], slab, preferred_element_type=jnp.float32)  # single MXU matmul
    o_ref[...] = (acc + b_ref[...]).astype(o_ref.dtype)


def _pointwise_conv_kernel(xb_ref, w_ref, b_ref, o_ref, *, L):
    # K == 1: no padding, no halos — a pointwise matmul per tile.
    t = pl.program_id(1)
    TL = o_ref.shape[-1]
    col = t * TL + lax.broadcasted_iota(jnp.int32, (1, TL), 1)
    xb = jnp.where(col < L, xb_ref[...], 0.0).astype(jnp.bfloat16)
    acc = jnp.dot(w_ref[...], xb, preferred_element_type=jnp.float32)
    o_ref[...] = (acc + b_ref[...]).astype(o_ref.dtype)


def samepad_conv_pallas(x, w2, b2, *, K, dilation, pad, L_out, TL, TH, out_dtype):
    # x:  (B, C_in, L)  unpadded, native dtype (pad + cast happen in-kernel)
    # w2: (C_out, K*C_in) bf16  (f folded in)
    # b2: (C_out, 1)      f32   (f and calibrated b folded in)
    B, C_in, L = x.shape
    C_out = w2.shape[0]
    num_tiles = _cdiv(L_out, TL)
    nb_TL = max(_cdiv(L, TL), 1)

    if K == 1:
        kernel = functools.partial(_pointwise_conv_kernel, L=L)
        in_specs = [
            pl.BlockSpec((None, C_in, TL), lambda b, t: (b, 0, jnp.minimum(t, nb_TL - 1))),
            pl.BlockSpec((C_out, K * C_in), lambda b, t: (0, 0)),
            pl.BlockSpec((C_out, 1), lambda b, t: (0, 0)),
        ]
        args = (x, w2, b2)
    else:
        assert TL % TH == 0, (TL, TH)                       # halo index math relies on this
        assert TH >= (K - 1) * dilation and TH >= pad, (TH, K, dilation, pad)
        ratio = TL // TH
        nb_TH = max(_cdiv(L, TH), 1)
        kernel = functools.partial(_samepad_conv_kernel, K=K, dilation=dilation,
                                   pad=pad, TH=TH, L=L)
        in_specs = [
            # left halo: the TH-block just before this body tile (clamped at 0; the kernel
            # zeroes it on tile 0, which realises the left "same" padding)
            pl.BlockSpec((None, C_in, TH),
                         lambda b, t: (b, 0, jnp.maximum(t * ratio - 1, 0))),
            # body tile (clamped; columns >= L are zero-masked in-kernel)
            pl.BlockSpec((None, C_in, TL),
                         lambda b, t: (b, 0, jnp.minimum(t, nb_TL - 1))),
            # right halo: first TH-block after this body tile (clamped; intended columns
            # >= L are zero-masked in-kernel, which also realises the right "same" padding)
            pl.BlockSpec((None, C_in, TH),
                         lambda b, t: (b, 0, jnp.minimum((t + 1) * ratio, nb_TH - 1))),
            pl.BlockSpec((C_out, K * C_in), lambda b, t: (0, 0)),
            pl.BlockSpec((C_out, 1), lambda b, t: (0, 0)),
        ]
        args = (x, x, x, w2, b2)

    return pl.pallas_call(
        kernel,
        out_shape=jax.ShapeDtypeStruct((B, C_out, L_out), out_dtype),
        grid_spec=pltpu.PrefetchScalarGridSpec(
            num_scalar_prefetch=0,
            grid=(B, num_tiles),
            in_specs=in_specs,
            out_specs=pl.BlockSpec((None, C_out, TL), lambda b, t: (b, 0, t)),
        ),
        compiler_params=pltpu.CompilerParams(
            dimension_semantics=("parallel", "parallel"),   # shard (B, L_tiles) across TCs
            vmem_limit_bytes=_vmem_budget_bytes(),          # generation-aware scoped limit
        ),
    )(*args)


# ------------------------------------------------------------------
# SamePadConv module (parameters + forward), conv hot-path in Pallas
# ------------------------------------------------------------------
class SamePadConvPallas:
    def __init__(self, in_channels, out_channels, kernel_size, dilation=1, key=None):
        assert out_channels % in_channels == 0
        self.in_channels = in_channels
        self.out_channels = out_channels
        self.kernel_size = kernel_size
        self.dilation = dilation
        self.receptive_field = (kernel_size - 1) * dilation + 1
        self.padding = self.receptive_field // 2

        self.n_chunks = in_channels
        self.dim = out_channels * in_channels * kernel_size          # conv.weight.numel()
        self.chunk_in_d = self.dim // self.n_chunks                  # out_channels * kernel_size
        self.chunk_out_d = (in_channels * kernel_size) // self.n_chunks   # kernel_size
        nh = 64
        opc = out_channels // in_channels

        keys = jax.random.split(key, 8)
        s = 0.1
        # conv weight (O, I, K); Conv1d bias=False, the extra .bias parameter starts at zeros
        self.conv_weight = s * jax.random.normal(keys[0], (out_channels, in_channels, kernel_size), jnp.float32)
        self.bias = jnp.zeros((out_channels,), jnp.float32)
        # controller: Linear(chunk_in_d, nh) + SiLU
        self.ctrl_W = s * jax.random.normal(keys[1], (nh, self.chunk_in_d), jnp.float32)
        self.ctrl_b = s * jax.random.normal(keys[2], (nh,), jnp.float32)
        # calib heads
        self.calw_W = s * jax.random.normal(keys[3], (self.chunk_out_d, nh), jnp.float32)
        self.calw_b = s * jax.random.normal(keys[4], (self.chunk_out_d,), jnp.float32)
        self.calb_W = s * jax.random.normal(keys[5], (opc, nh), jnp.float32)
        self.calb_b = s * jax.random.normal(keys[6], (opc,), jnp.float32)
        self.calf_W = s * jax.random.normal(keys[7], (opc, nh), jnp.float32)
        self.calf_b = 0.1 * jnp.ones((opc,), jnp.float32)
        # grads buffer (zeros -> controller input is zeros, matching a fresh module)
        self.grads = jnp.zeros((self.dim,), jnp.float32)
        # TODO(synk): store_grad / f_grads & q_ema EMAs / trigger-driven W memory retrieval are
        # training-time state machinery not exercised by forward (trigger == 0); not implemented.

    def fw_chunks(self):
        xg = self.grads.reshape(self.n_chunks, -1)                    # (I, chunk_in_d)
        h = xg @ self.ctrl_W.T + self.ctrl_b
        rep = h * jax.nn.sigmoid(h)                                   # SiLU
        w = rep @ self.calw_W.T + self.calw_b                         # (I, K)
        b = rep @ self.calb_W.T + self.calb_b                         # (I, O//I)
        f = rep @ self.calf_W.T + self.calf_b                         # (I, O//I)
        return w[None], b.reshape(-1), f.reshape(-1)                  # (1,I,K), (O,), (O,)

    def forward(self, x_ncl, out_dtype=jnp.float32):
        # x_ncl: (B, C_in, L) NCL.  Returns (B, C_out, L_out) NCL.
        w, b, f = self.fw_chunks()
        cw = self.conv_weight * w                                     # (O, I, K)
        w_eff = cw * f[:, None, None]                                 # fold output-channel scale f
        bias_eff = (self.bias * b) * f                                # (O,)  f folded into bias too

        B, C_in, L = x_ncl.shape
        K, d, pad = self.kernel_size, self.dilation, self.padding
        C_out = self.out_channels
        halo = (K - 1) * d
        L_out = L + 2 * pad - halo

        # TH = 128-aligned halo block; TL = VMEM-budget / occupancy-aware body tile.
        TH = _round_up(max(halo, 1), 128) if K > 1 else 128
        out_bytes = jnp.dtype(out_dtype).itemsize
        TL = _pick_tile_length(L_out, TH, C_in, C_out, K, B, out_bytes)

        # (O, I, K) -> (O, K*C_in): tap-major / channel-minor, matching the in-kernel slab.
        w2 = jnp.transpose(w_eff, (0, 2, 1)).reshape(C_out, K * C_in).astype(jnp.bfloat16)
        b2 = bias_eff.reshape(C_out, 1).astype(jnp.float32)

        return samepad_conv_pallas(x_ncl, w2, b2, K=K, dilation=d, pad=pad,
                                   L_out=L_out, TL=TL, TH=TH, out_dtype=out_dtype)

    # Pure-JAX f32 reference of the same forward (for verification).
    def forward_ref(self, x_ncl):
        w, b, f = self.fw_chunks()
        cw = self.conv_weight * w
        conv_out = lax.conv_general_dilated(
            x_ncl, cw, window_strides=(1,), padding=[(self.padding, self.padding)],
            rhs_dilation=(self.dilation,),
            dimension_numbers=("NCH", "OIH", "NCH"),
            precision=lax.Precision.HIGHEST)
        conv_out = conv_out + (self.bias * b)[None, :, None]
        return f[None, :, None] * conv_out


if __name__ == "__main__":
    key = jax.random.PRNGKey(0)

    def check(B, C_in, C_out, K, dilation, L, k_param, k_x,
              out_dtype=jnp.float32, tol=2e-2):
        mod = SamePadConvPallas(C_in, C_out, K, dilation=dilation, key=k_param)
        x = jax.random.normal(k_x, (B, C_in, L), jnp.float32)
        out = jax.block_until_ready(mod.forward(x, out_dtype=out_dtype))
        ref = mod.forward_ref(x)
        assert out.shape == ref.shape, (out.shape, ref.shape)
        err = float(jnp.max(jnp.abs(out.astype(jnp.float32) - ref)))
        scale = float(jnp.max(jnp.abs(ref))) + 1e-6
        # Kernel runs the matmul in bf16 (intentional) against an f32 HIGHEST reference.
        assert err <= tol * scale, (err, scale)

    keys = jax.random.split(key, 8)
    check(2, 4, 8, 3, 1, 16, keys[0], keys[1])     # tiny, single tile, left/right pad
    check(2, 4, 8, 3, 2, 900, keys[2], keys[3])    # dilation=2, multi L-tile, partial last tile
    check(2, 4, 8, 1, 1, 300, keys[4], keys[5])    # K=1 pointwise path (no halo streams)
    check(2, 4, 8, 2, 1, 100, keys[6], keys[7])    # even receptive field -> L_out = L + 1
    # bf16 output path (halves output writeback when the consumer accepts bf16)
    check(2, 4, 8, 3, 2, 900, keys[2], keys[3], out_dtype=jnp.bfloat16, tol=4e-2)
    print("KERNEL_OK")
</pallas_src>

<mosaic_0001>
module attributes {stable_mosaic.version = 11 : i64} {
  func.func @_samepad_conv_kernel(%arg0: i32, %arg1: i32, %arg2: memref<1x4x128xf32, #tpu.memory_space<vmem>>, %arg3: memref<1x4x128xf32, #tpu.memory_space<vmem>>, %arg4: memref<1x4x128xf32, #tpu.memory_space<vmem>>, %arg5: memref<8x12xbf16, #tpu.memory_space<vmem>>, %arg6: memref<8x1xf32, #tpu.memory_space<vmem>>, %arg7: memref<1x8x128xf32, #tpu.memory_space<vmem>>) attributes {dimension_semantics = [#tpu.dimension_semantics<parallel>, #tpu.dimension_semantics<parallel>], iteration_bounds = array<i64: 2, 1>, scalar_prefetch = 0 : i64, scratch_operands = 0 : i64, tpu.core_type = #tpu.core_type<tc>, window_params = [{transform_indices = @transform_0, window_bounds = array<i64: 1, 4, 128>}, {transform_indices = @transform_1, window_bounds = array<i64: 1, 4, 128>}, {transform_indices = @transform_2, window_bounds = array<i64: 1, 4, 128>}, {pipeline_mode = #tpu.pipeline_mode<synchronous>, transform_indices = @transform_3, window_bounds = array<i64: 8, 12>}, {pipeline_mode = #tpu.pipeline_mode<synchronous>, transform_indices = @transform_4, window_bounds = array<i64: 8, 1>}, {transform_indices = @transform_5, window_bounds = array<i64: 1, 8, 128>}]} {
    %c128_i32 = arith.constant 128 : i32
    %0 = arith.muli %arg1, %c128_i32 : i32
    %1 = tpu.iota {dimensions = array<i32: 1>} : vector<1x128xi32>
    %2 = vector.broadcast %0 : i32 to vector<1x128xi32>
    %3 = arith.addi %2, %1 : vector<1x128xi32>
    %c16_i32 = arith.constant 16 : i32
    %4 = vector.broadcast %c16_i32 : i32 to vector<1x128xi32>
    %5 = arith.cmpi slt, %3, %4 : vector<1x128xi32>
    %c0 = arith.constant 0 : index
    %c0_0 = arith.constant 0 : index
    %c0_1 = arith.constant 0 : index
    %6 = vector.load %arg3[%c0, %c0_0, %c0_1] : memref<1x4x128xf32, #tpu.memory_space<vmem>>, vector<1x4x128xf32>
    %7 = vector.shape_cast %6 : vector<1x4x128xf32> to vector<4x128xf32>
    %cst = arith.constant 0.000000e+00 : f32
    %8 = vector.shape_cast %5 : vector<1x128xi1> to vector<1x128xi1>
    %9 = vector.broadcast %8 : vector<1x128xi1> to vector<4x128xi1>
    %10 = vector.broadcast %cst : f32 to vector<4x128xf32>
    %11 = arith.select %9, %7, %10 : vector<4x128xi1>, vector<4x128xf32>
    %12 = arith.truncf %11 : vector<4x128xf32> to vector<4x128xbf16>
    %c128_i32_2 = arith.constant 128 : i32
    %13 = arith.addi %0, %c128_i32_2 : i32
    %14 = tpu.iota {dimensions = array<i32: 1>} : vector<1x128xi32>
    %15 = vector.broadcast %13 : i32 to vector<1x128xi32>
    %16 = arith.addi %15, %14 : vector<1x128xi32>
    %c16_i32_3 = arith.constant 16 : i32
    %17 = vector.broadcast %c16_i32_3 : i32 to vector<1x128xi32>
    %18 = arith.cmpi slt, %16, %17 : vector<1x128xi32>
    %c0_4 = arith.constant 0 : index
    %c0_5 = arith.constant 0 : index
    %c0_6 = arith.constant 0 : index
    %19 = vector.load %arg4[%c0_4, %c0_5, %c0_6] : memref<1x4x128xf32, #tpu.memory_space<vmem>>, vector<1x4x128xf32>
    %20 = vector.shape_cast %19 : vector<1x4x128xf32> to vector<4x128xf32>
    %cst_7 = arith.constant 0.000000e+00 : f32
    %21 = vector.shape_cast %18 : vector<1x128xi1> to vector<1x128xi1>
    %22 = vector.broadcast %21 : vector<1x128xi1> to vector<4x128xi1>
    %23 = vector.broadcast %cst_7 : f32 to vector<4x128xf32>
    %24 = arith.select %22, %20, %23 : vector<4x128xi1>, vector<4x128xf32>
    %25 = arith.truncf %24 : vector<4x128xf32> to vector<4x128xbf16>
    %c0_i32 = arith.constant 0 : i32
    %26 = arith.cmpi sgt, %arg1, %c0_i32 : i32
    %c0_8 = arith.constant 0 : index
    %c0_9 = arith.constant 0 : index
    %c0_10 = arith.constant 0 : index
    %27 = vector.load %arg2[%c0_8, %c0_9, %c0_10] : memref<1x4x128xf32, #tpu.memory_space<vmem>>, vector<1x4x128xf32>
    %28 = vector.shape_cast %27 : vector<1x4x128xf32> to vector<4x128xf32>
    %cst_11 = arith.constant 0.000000e+00 : f32
    %29 = vector.broadcast %cst_11 : f32 to vector<4x128xf32>
    %30 = arith.select %26, %28, %29 : vector<4x128xf32>
    %31 = arith.truncf %30 : vector<4x128xf32> to vector<4x128xbf16>
    %32 = vector.extract_strided_slice %31 {offsets = [0, 127], sizes = [4, 1], strides = [1, 1]} : vector<4x128xbf16> to vector<4x1xbf16>
    %33 = vector.extract_strided_slice %12 {offsets = [0, 0], sizes = [4, 127], strides = [1, 1]} : vector<4x128xbf16> to vector<4x127xbf16>
    %34 = tpu.concatenate %32, %33 in 1 : vector<4x1xbf16>, vector<4x127xbf16> -> vector<4x128xbf16>
    %35 = vector.extract_strided_slice %12 {offsets = [0, 1], sizes = [4, 127], strides = [1, 1]} : vector<4x128xbf16> to vector<4x127xbf16>
    %36 = vector.extract_strided_slice %25 {offsets = [0, 0], sizes = [4, 1], strides = [1, 1]} : vector<4x128xbf16> to vector<4x1xbf16>
    %37 = tpu.concatenate %35, %36 in 1 : vector<4x127xbf16>, vector<4x1xbf16> -> vector<4x128xbf16>
    %38 = tpu.concatenate %34, %12, %37 in 0 : vector<4x128xbf16>, vector<4x128xbf16>, vector<4x128xbf16> -> vector<12x128xbf16>
    %c0_12 = arith.constant 0 : index
    %c0_13 = arith.constant 0 : index
    %39 = vector.load %arg5[%c0_12, %c0_13] : memref<8x12xbf16, #tpu.memory_space<vmem>>, vector<8x12xbf16>
    %cst_14 = arith.constant dense<0.000000e+00> : vector<8x128xf32>
    %40 = tpu.matmul %39, %38, %cst_14 {dimension_numbers = #tpu.dot_dimension_numbers<[1], [0], [0], [1], [0, 0, 1, 1], [], []>} : vector<8x12xbf16>, vector<12x128xbf16>, vector<8x128xf32> -> vector<8x128xf32>
    %c0_15 = arith.constant 0 : index
    %c0_16 = arith.constant 0 : index
    %41 = vector.load %arg6[%c0_15, %c0_16] : memref<8x1xf32, #tpu.memory_space<vmem>>, vector<8x1xf32>
    %42 = vector.broadcast %41 : vector<8x1xf32> to vector<8x128xf32>
    %43 = arith.addf %40, %42 : vector<8x128xf32>
    %c0_17 = arith.constant 0 : index
    %c0_18 = arith.constant 0 : index
    %c0_19 = arith.constant 0 : index
    %44 = vector.load %arg7[%c0_17, %c0_18, %c0_19] : memref<1x8x128xf32, #tpu.memory_space<vmem>>, vector<1x8x128xf32>
    %45 = vector.shape_cast %44 : vector<1x8x128xf32> to vector<8x128xf32>
    %46 = vector.shape_cast %43 : vector<8x128xf32> to vector<1x8x128xf32>
    tpu.vector_store %arg7[%c0_17, %c0_18, %c0_19], %46 {strides = array<i32>} : memref<1x8x128xf32, #tpu.memory_space<vmem>>, vector<1x8x128xf32>,
    return
  }
  func.func @transform_0(%arg0: i32, %arg1: i32) -> (i32, i32, i32) {
    %c1_i32 = arith.constant 1 : i32
    %0 = arith.muli %arg1, %c1_i32 : i32
    %c1_i32_0 = arith.constant 1 : i32
    %1 = arith.subi %0, %c1_i32_0 : i32
    %c0_i32 = arith.constant 0 : i32
    %2 = arith.maxsi %1, %c0_i32 : i32
    %c0_i32_1 = arith.constant 0 : i32
    %c0_i32_2 = arith.constant 0 : i32
    return %arg0, %c0_i32_1, %2 : i32, i32, i32
  }
  func.func @transform_1(%arg0: i32, %arg1: i32) -> (i32, i32, i32) {
    %c0_i32 = arith.constant 0 : i32
    %0 = arith.minsi %arg1, %c0_i32 : i32
    %c0_i32_0 = arith.constant 0 : i32
    %c0_i32_1 = arith.constant 0 : i32
    return %arg0, %c0_i32_0, %0 : i32, i32, i32
  }
  func.func @transform_2(%arg0: i32, %arg1: i32) -> (i32, i32, i32) {
    %c1_i32 = arith.constant 1 : i32
    %0 = arith.addi %arg1, %c1_i32 : i32
    %c1_i32_0 = arith.constant 1 : i32
    %1 = arith.muli %0, %c1_i32_0 : i32
    %c0_i32 = arith.constant 0 : i32
    %2 = arith.minsi %1, %c0_i32 : i32
    %c0_i32_1 = arith.constant 0 : i32
    %c0_i32_2 = arith.constant 0 : i32
    return %arg0, %c0_i32_1, %2 : i32, i32, i32
  }
  func.func @transform_3(%arg0: i32, %arg1: i32) -> (i32, i32) {
    %c0_i32 = arith.constant 0 : i32
    %c0_i32_0 = arith.constant 0 : i32
    %c0_i32_1 = arith.constant 0 : i32
    return %c0_i32, %c0_i32_0 : i32, i32
  }
  func.func @transform_4(%arg0: i32, %arg1: i32) -> (i32, i32) {
    %c0_i32 = arith.constant 0 : i32
    %c0_i32_0 = arith.constant 0 : i32
    %c0_i32_1 = arith.constant 0 : i32
    return %c0_i32, %c0_i32_0 : i32, i32
  }
  func.func @transform_5(%arg0: i32, %arg1: i32) -> (i32, i32, i32) {
    %c0_i32 = arith.constant 0 : i32
    %c0_i32_0 = arith.constant 0 : i32
    return %arg0, %c0_i32, %arg1 : i32, i32, i32
  }
}

</mosaic_0001>

<bundles_post_ra>
// kernel: tpu_custom_call.1
= control target key start
LH: loop header
LB: loop body
LE: loop exit
PB: predicated region body
PF: predicated region fallthrough
CT: control target
= control target key end

     0   :  { %10 = vsyncpa [#allocation3], 0  ;;  %s1023_s0 = inlined_call_operand.vmem [shape: f32[2,4,16], index: 0, kind: input, shape index: {}]   ;;  %s1024_s1 = inlined_call_operand.hbm [shape: f32[2,4,16], index: 1, kind: input, shape index: {}]   ;;  %s1025_s2 = inlined_call_operand.vmem [shape: f32[2,4,16], index: 2, kind: input, shape index: {}]   ;;  %s1026_s3 = inlined_call_operand.vmem [shape: bf16[8,12], index: 3, kind: input, shape index: {}]   ;;  %s1027_s4 = inlined_call_operand.vmem [shape: f32[8,1], index: 4, kind: input, shape index: {}]   ;;  %s1028_s5 = inlined_call_operand.hbm [shape: f32[2,8,16], index: 5, kind: output, shape index: {}]  }
   0x1   :  { %12 = vsyncpa [#allocation3 + $0x1], 0 }
   0x2   :  { %13 = vsyncpa [#allocation4], 0 }
   0x3   :  { %15 = vsyncpa [#allocation4 + $0x1], 0  ;;  %s844_s0 = smov 0   ;;  %s846_s18 = smov 0  }
   0x4   :  { %s848_s19 = smov 0   ;;  %s850_s2 = smov 0  }
   0x5   :  { %s852_s20 = smov 0   ;;  %s854_s21 = smov 0  }
   0x6 LB: > { %s599_s22 = sadd.s32 4294967295, %s804_s21   ;;  %s600_s23 = sadd.s32 4294967294, %s804_s21   ;;  %s804_s21 = sphi %s854_s21, %s21_s21   ;;  %s800_s20 = sphi %s852_s20, %s1044_s20   ;;  %s796_s2 = sphi %s850_s2, %s1043_s2   ;;  %s792_s19 = sphi %s848_s19, %s1042_s19   ;;  %s788_s18 = sphi %s846_s18, %s1041_s18   ;;  %s784_s0 = sphi %s844_s0, %s1040_s0  }
   0x7   : > { %s33_s24 = sadd.s32 1, %s800_s20  ;;  %s80_s25 = sadd.s32 1, %s792_s19 }
   0x8   : > { %p35_p0 = scmp.ge.s32.totalorder %s33_s24, 2  ;;  %p87_p1 = scmp.ne.s32.totalorder %s792_s19, %s788_s18 }
   0x9   : > { %p88_p2 = scmp.eq.s32.totalorder %s804_s21, 0  ;;  %p93_p3 = scmp.ne.s32.totalorder %s788_s18, %s784_s0 }
   0xa   : > { %s1046_s24 = smov (%p35_p0, %s33_s24), 0  ;;  %p94_p5 = scmp.eq.s32.totalorder %s599_s22, 0 }
   0xb   : > { %p885_p4 = por %p88_p2, %p87_p1  ;;  %s75_s27 = ssub.s32 %s800_s20, %s1046_s24 }
   0xc   : > { %p195_p6 = scmp.eq.s32.totalorder %s599_s22, 1  ;;  %p78_p7 = scmp.eq.s32.totalorder %s75_s27, 0 }
   0xd   : > { %p891_p8 = por %p94_p5, %p93_p3  ;;  %p201_p10 = scmp.eq.s32.totalorder %s600_s23, 1 }
   0xe   : > { %p895_p9 = por %p195_p6, %p87_p1  ;;  %p635_p13 = scmp.lt.s32.totalorder %s804_s21, 2 }
   0xf   : > { %s900_s30 = scalar_select %p78_p7, %s792_s19, %s80_s25  }
  0x10   : > { %s1032_s29 = scalar_select %p895_p9, 1, 0 }
  0x11   : > { %p902_p11 = por %p201_p10, %p93_p3  ;;  %s243_s7 = sand.u32 1, %s792_s19  }
  0x12   : > { %s603_s8 = sshll.u32 %s243_s7, 2  ;;  %s604_s9 = sshll.u32 %s800_s20, 6 }
  0x13   : > { %s1033_s6 = scalar_select %p902_p11, 1, 0 }
  0x14   : > { %s913_s12 = scalar_lea.hbm %s1024_s1, %s604_s9  ;;  %s247_s13 = scalar_lea.vmem [#allocation2], %s603_s8 }
  0x15   : > { %s257_s14 = sshll.u32 %s247_s13, 4  ;;  %p919_p0 = pnand %p635_p13, %p885_p4  ;;  %s915_s14 = int_to_ptr.vmem [resolvable:$true] %s257_s14 }
  0x16   : > { %s244_s16 = scalar_lea.sflag [#allocation3], %s243_s7  ;;  %s692_s17 = scalar_lea.hbm %s913_s12, 64 }
  0x17   : > { %p693_p3 = scmp.ne.s32.totalorder %s913_s12, %s692_s17  ;;  %p694_p5 = pneg %p919_p0 }
  0x18   : > { %s697_s25 = scalar_lea.hbm %s1024_s1, 128  ;;  %p698_p4 = scmp.lt.u32.totalorder %s913_s12, %s1024_s1 }
  0x19   : > { %p695_p6 = pnand %p694_p5, %p693_p3  ;;  %p699_p10 = scmp.lt.u32.totalorder %s697_s25, %s692_s17 }
  0x1a   : > { %p701_p12 = scmp.lt.u32.totalorder %s692_s17, %s913_s12 }
  0x1b   : > { %p696_p7 = pneg %p695_p6  ;;  %p700_p13 = por %p699_p10, %p698_p4 }
  0x1d   : > { %p702_p1 = por %p701_p12, %p700_p13 }
  0x1f   : > { %p703_p2 = pnand %p702_p1, %p696_p7 }
  0x21   : > { %706 = shalt.err (!%p703_p2)
}
  0x22   : > { %s707_s7 = scalar_lea.vmem %s915_s14, 64  ;;  %s806_s8 = smov [#allocation2]  }
  0x23   : > { %p708_p3 = scmp.ne.s32.totalorder %s915_s14, %s707_s7  ;;  %s712_s9 = sshll.u32 %s806_s8, 4  ;;  %s713_s9 = int_to_ptr.vmem [resolvable:$false] %s712_s9 }
  0x24   : > { %s714_s10 = scalar_lea.vmem %s713_s9, 128  ;;  %p715_p9 = scmp.lt.s32.totalorder %s915_s14, %s713_s9 }
  0x25   : > { %p710_p6 = pnand %p708_p3, %p694_p5  ;;  %p716_p4 = scmp.lt.s32.totalorder %s714_s10, %s707_s7 }
  0x27   : > { %p711_p11 = pneg %p710_p6  ;;  %p717_p10 = por %p716_p4, %p715_p9 }
  0x29   : > { %p718_p12 = pnand %p717_p10, %p711_p11 }
  0x2b   : > { %721 = shalt.err (!%p718_p12)
}
  0x2c   : > { %630 = dma.hbm_to_vmem [thread:$0]  (!%p919_p0), %s913_s12, 64, %s915_s14, %s244_s16  }
  0x2d   : > { %p1035_p1 = scmp.lt.s32.totalorder %s804_s21, 3  ;;  %p1036_p2 = scmp.ge.s32.totalorder %s804_s21, 1 }
  0x2f   : > { %p279_p5 = pnand %p1036_p2, %p1035_p1 }
  0x30   : > { %s955_s11 = sand.u32 (!%p279_p5), 1, %s788_s18  }
  0x31   : > { %282 = sbr.rel (%p279_p5) target bundleno = 420 (0x1a4), region = 40  ;;  %s606_s13 = sshll.u32 (!%p279_p5), %s955_s11, 2 }
  0x32   : > { %s285_s17 = scalar_lea.sflag (!%p279_p5), [#allocation3], %s955_s11  ;;  %s288_s22 = scalar_lea.vmem (!%p279_p5), [#allocation2], %s606_s13 }
  0x38   : > { %775 = dma.done.wait (%p891_p8), %s285_s17, 64  }
  0x39   : > { %777 = vsyncadd (%p891_p8), %s285_s17, 4294967232  ;;  %v365_v0 = vlaneseq  ;;  %v807_v1 = vmov 0.0|0.0   ;;  %s808_s12 = smov 1   ;;  %v809_v3 = vmov 0.0   ;;  %v370_v4 = vld [vmem:[%s288_s22] sm:$0xf] }
  0x3a   : > { %392 = vrot.lane.b32.xlu1 %v807_v1, %s808_s12  ;;  %617 = vmatprep.subr.bf16.mxu0 %v809_v3  ;;  %vm810_vm1 = vmmov 0   ;;  %s811_s14 = smov 127   ;;  %v812_v7 = vmov 0   ;;  %v420_v8 = vld [vmem:[%s1027_s4] sm:$0xff]  ;;  %vm397_vm2 = vcmask 7168   ;;  %vm406_vm3 = vcmask 1039360  }
  0x3b   : > { %v366_v2 = vand.u32 127, %v365_v0  ;;  %619 = vmatprep.mubr.msk.bf16.mxu0 %vm810_vm1, %v809_v3  ;;  %691 = vset.pattern.permute.xlu0 %v812_v7  ;;  %vm413_vm4 = vcmask 1041408   ;;  %vm416_vm5 = vcmask 1043456   ;;  %vm430_vm6 = vcmask 1045504   ;;  %v419_v20 = vld [vmem:[%s1026_s3] sm:$0xf] }
  0x3c   : > { %vm426_vm7 = vcmask 97280   ;;  %s607_s25 = sshll.u32 %s955_s11, 3  ;;  %s612_s26 = sshll.u32 %s796_s2, 7 }
  0x3d   : > { %vm369_vm0 = vcmp.lt.s32.totalorder %v366_v2, 16  ;;  %s334_s27 = scalar_lea.vmem [#allocation5], %s607_s25  ;;  %s974_s10 = scalar_lea.hbm %s1028_s5, %s612_s26 }
  0x3e   : > { %v373_v5 = vsel %vm369_vm0, %v370_v4, 0.0  ;;  %s489_s7 = sshll.u32 %s334_s27, 4  ;;  %s475_s13 = scalar_lea.sflag [#allocation4], %s955_s11  ;;  %s976_s7 = int_to_ptr.vmem [resolvable:$true] %s489_s7 }
  0x3f   : > { %v374_v6 = vpack.c.bf16 %v373_v5, %v373_v5  ;;  %s722_s2 = scalar_lea.vmem %s976_s7, 128  ;;  %p1037_p9 = scmp.ne.s32.totalorder %s1032_s29, 0 }
  0x40   : > { %p723_p8 = scmp.ne.s32.totalorder %s976_s7, %s722_s2  ;;  %s813_s17 = smov [#allocation5]  }
  0x41   : > { %401 = vrot.lane.b32.xlu0 %v374_v6, %s811_s14  ;;  %395 = vrot.lane.b32.xlu1 %v374_v6, %s808_s12  ;;  %v410_v12 = vrot.slane %v374_v6, 6  ;;  %s726_s22 = sshll.u32 %s813_s17, 4  ;;  %s727_s22 = int_to_ptr.vmem [resolvable:$false] %s726_s22 }
  0x42   : > { %p724_p11 = pnand %p723_p8, %p1037_p9  ;;  %s728_s12 = scalar_lea.vmem %s727_s22, 256 }
  0x43   : > { %p729_p7 = scmp.lt.s32.totalorder %s976_s7, %s727_s22  ;;  %p730_p13 = scmp.lt.s32.totalorder %s728_s12, %s722_s2 }
  0x44   : > { %p725_p0 = pneg %p724_p11 }
  0x45   : > { %404 = vrot.lane.b32.xlu0 %v807_v1, %s811_s14  ;;  %p731_p3 = por %p730_p13, %p729_p7 }
  0x47   : > { %p732_p6 = pnand %p731_p3, %p725_p0 }
  0x49   : > { %423 = vperm.xlu0 %691, %v420_v8  }
  0xac   : > { %v393_v9 = vpop.permute.xlu1 %392 }
  0xb3   : > { %v402_v10 = vpop.permute.xlu0 %401  ;;  %v396_v11 = vpop.permute.xlu1 %395 }
  0xb4   : > { %v400_v13 = vsel %vm397_vm2, %v393_v9, %v396_v11 }
  0xb5   : > { %v415_v17 = vsel %vm413_vm4, %v400_v13, %v410_v12 }
  0xb7   : > { %v405_v14 = vpop.permute.xlu0 %404 }
  0xb8   : > { %v409_v15 = vsel %vm406_vm3, %v402_v10, %v405_v14 }
  0xb9   : > { %v412_v16 = vrot.slane %v409_v15, 4 }
  0xbb   : > { %v418_v18 = vsel %vm416_vm5, %v415_v17, %v412_v16 }
  0xbc   : > { %v431_v19 = vsel %vm430_vm6, %v418_v18, 0 }
  0xbd   : > { %618 = vmatpush3.bf16.msra.mxu0 %v431_v19 }
  0xc0   : > { %620 = vmatmul.mubr.msk.bf16.vlgmr.msra.gmra.mrb[0].mxu0 %vm426_vm7, %v419_v20 }
  0xc8   : > { %v424_v21 = vpop.permute.xlu0 %423 }
 0x193   : > { %v467_v22 = vpop.f32.mrb[0].mxu0 }
 0x194   : > { %v468_v23 = vadd.f32 %v467_v22, %v424_v21  ;;  %v621_v24 = vpop.f32.mrb[1].mxu0 }
 0x195   : > { %v470_v25 = vpop.f32.mrb[2].mxu0 }
 0x196   : > { %473 = vst [vmem:[%s334_s27] sm:$0xff] %v468_v23  ;;  %v622_v26 = vpop.f32.mrb[3].mxu0 }
 0x197   : > { %735 = shalt.err (!%p732_p6)
}
 0x198   : > { %s736_s11 = scalar_lea.hbm %s974_s10, 128  ;;  %s740_s15 = scalar_lea.hbm %s1028_s5, 256 }
 0x199   : > { %p737_p4 = scmp.ne.s32.totalorder %s974_s10, %s736_s11  ;;  %p741_p1 = scmp.lt.u32.totalorder %s974_s10, %s1028_s5 }
 0x19a   : > { %p742_p2 = scmp.lt.u32.totalorder %s740_s15, %s736_s11  ;;  %p744_p8 = scmp.lt.u32.totalorder %s736_s11, %s974_s10 }
 0x19b   : > { %p738_p10 = pnand %p737_p4, %p1037_p9 }
 0x19c   : > { %p743_p5 = por %p742_p2, %p741_p1 }
 0x19d   : > { %p739_p12 = pneg %p738_p10 }
 0x19e   : > { %p745_p11 = por %p744_p8, %p743_p5 }
 0x1a0   : > { %p746_p0 = pnand %p745_p11, %p739_p12 }
 0x1a2   : > { %749 = shalt.err (!%p746_p0)
}
 0x1a3   : > { %625 = dma.vmem_to_hbm [thread:$0]  (%p1037_p9), %s976_s7, 128, %s974_s10, %s475_s13  }
 0x1a4 PF: > { %s501_s25 = sand.u32 1, %s784_s0   ;;  %p1038_p7 = scmp.ne.s32.totalorder %s1033_s6, 0 }
 0x1a5   : > { %p1039_p13 = scmp.ge.s32.totalorder %s804_s21, 2  ;;  %s502_s26 = scalar_lea.sflag [#allocation4], %s501_s25 }
 0x1a7   : > { %p632_p3 = pnand %p1039_p13, %p1038_p7 }
 0x1a9   : > { %779 = dma.done.wait (!%p632_p3), %s502_s26, 128  }
 0x1aa   : > { %781 = vsyncadd (!%p632_p3), %s502_s26, 4294967168  ;;  %s21_s21 = sadd.s32 1, %s804_s21   ;;  %s1040_s0 = smov %s788_s18 }
 0x1ab   : > { %p18_p6 = scmp.ge.s32.totalorder %s21_s21, 4   ;;  %s1041_s18 = smov %s792_s19 }
 0x1ac   : > { %s1042_s19 = smov %s900_s30  ;;  %s1043_s2 = smov %s800_s20 }
 0x1ad   : > { %s1044_s20 = smov %s1046_s24  ;;  %20 = sbr.rel (!%p18_p6) target bundleno = 6 (0x6), region = 91 }
 0x1b4   :  { %507 = vsyncpa [#allocation3], 1 }
 0x1b5   :  { %509 = vsyncpa [#allocation3 + $0x1], 1 }
 0x1b6   :  { %510 = vsyncpa [#allocation4], 1 }
 0x1b7   :  { %512 = vsyncpa [#allocation4 + $0x1], 1 }

</bundles_post_ra>
